<compile_context>
chip_gen: v5e
topology: v5e:2x2
jax: 0.10.0
libtpu: 0.0.40
codegen_flags: <defaults>
</compile_context>

<pallas_src>
import functools
import math

import numpy as np
import jax
import jax.numpy as jnp
from jax import lax
from jax.experimental import pallas as pl
from jax.experimental.pallas import tpu as pltpu


# ----------------------------- helpers ---------------------------------------
def _layer_norm(x, eps=1e-12):
    # matches LayerNorm_torch.forward: (x - mean) / sqrt(var_biased + eps)
    # (gamma/beta exist on the torch module but are never applied in forward).
    mean = jnp.mean(x, axis=-1, keepdims=True)
    var = jnp.mean((x - mean) ** 2, axis=-1, keepdims=True)
    return (x - mean) * lax.rsqrt(var + eps)          # rsqrt -> EUP slot


def _tpu_vmem_capacity():
    try:
        return int(pltpu.get_tpu_info().vmem_capacity_bytes)
    except Exception:
        return 64 << 20   # conservative (v7x-sized) fallback when off-device


def _vmem_limit_bytes():
    cap = _tpu_vmem_capacity()
    # Explicit limit (never the 16/32 MiB default); leave headroom for
    # compiler-internal scratch, which matters most on v7x's 64 MiB/TC.
    return min(int(cap * 0.7), cap - (8 << 20))


def _attention_blocks(S):
    cap = _tpu_vmem_capacity()
    if cap <= (64 << 20):          # v7x: 64 MiB VMEM per TensorCore
        bq, bkv = 256, 256
    else:                          # v5e / v6e: 128 MiB -> larger kv tiles
        bq, bkv = 256, 512
    return min(S, bq), min(S, bkv)


def _const_spec(shape):
    nd = len(shape)
    return pl.BlockSpec(shape, lambda *_args, _nd=nd: (0,) * _nd)


# ----------------------------- kernel 1: QKV projection -----------------------
def _qkv_proj_kernel(x_ref, wq_ref, bq_ref, wk_ref, bk_ref, wv_ref, bv_ref,
                     q_ref, k_ref, v_ref, *, n_heads):
    x = x_ref[0].astype(jnp.bfloat16)                       # (ts, D)
    dh = x.shape[-1] // n_heads
    q = jnp.dot(x, wq_ref[...], preferred_element_type=jnp.float32) + bq_ref[...]
    k = jnp.dot(x, wk_ref[...], preferred_element_type=jnp.float32) + bk_ref[...]
    v = jnp.dot(x, wv_ref[...], preferred_element_type=jnp.float32) + bv_ref[...]
    # split_heads done ONCE per row tile (amortized over the whole kv loop of
    # the attention kernel) -> head-major (H, ts, dh) bf16 in HBM.
    for h in range(n_heads):
        q_ref[0, h] = q[:, h * dh:(h + 1) * dh].astype(jnp.bfloat16)
        k_ref[0, h] = k[:, h * dh:(h + 1) * dh].astype(jnp.bfloat16)
        v_ref[0, h] = v[:, h * dh:(h + 1) * dh].astype(jnp.bfloat16)


def qkv_proj_pallas(x, wq, bq, wk, bk, wv, bv, *, n_heads, block_s):
    B, S, D = x.shape
    dh = D // n_heads
    grid = (B, S // block_s)
    out_sd = jax.ShapeDtypeStruct((B, n_heads, S, dh), jnp.bfloat16)
    out_spec = pl.BlockSpec((1, n_heads, block_s, dh), lambda b, s: (b, 0, s, 0))
    return pl.pallas_call(
        functools.partial(_qkv_proj_kernel, n_heads=n_heads),
        out_shape=(out_sd, out_sd, out_sd),
        grid=grid,
        in_specs=[
            pl.BlockSpec((1, block_s, D), lambda b, s: (b, s, 0)),
            _const_spec((D, D)), _const_spec((1, D)),     # W_q (pre-scaled), b_q
            _const_spec((D, D)), _const_spec((1, D)),     # W_k, b_k
            _const_spec((D, D)), _const_spec((1, D)),     # W_v, b_v
        ],
        out_specs=[out_spec, out_spec, out_spec],
        compiler_params=pltpu.CompilerParams(
            dimension_semantics=("parallel", "parallel"),
            vmem_limit_bytes=_vmem_limit_bytes()),
    )(x, wq, bq, wk, bk, wv, bv)


# ----------------------------- kernel 2: flash attention + W_o + LN1 ----------
def _attention_kernel(q_ref, k_ref, v_ref, keep_ref, xres_ref, wo_ref, bo_ref,
                      out_ref, m_scr, l_scr, acc_scr, zc_scr, *, n_heads):
    kv = pl.program_id(2)

    @pl.when(kv == 0)
    def _init():
        m_scr[...] = jnp.full(m_scr.shape, -jnp.inf, dtype=m_scr.dtype)
        l_scr[...] = jnp.zeros(l_scr.shape, dtype=l_scr.dtype)
        acc_scr[...] = jnp.zeros(acc_scr.shape, dtype=acc_scr.dtype)

    # Q already carries the 1/sqrt(d_k/num_heads) scale (folded into W_q/b_q).
    s = jnp.einsum('hqd,hkd->hqk', q_ref[0], k_ref[0],
                   preferred_element_type=jnp.float32)      # (H, bq, bkv) f32
    masked = (keep_ref[0] == 0)[None, :, :]
    s = jnp.where(masked, -1000000000.0, s)

    m_prev = m_scr[...]
    m_new = jnp.maximum(m_prev, jnp.max(s, axis=-1, keepdims=True))
    alpha = jnp.exp(m_prev - m_new)
    # TODO(synk): exp could run in bf16 on v6e/v7x (bf16 EUP, ~2x throughput);
    # kept in f32 here for numerical margin against the torch reference.
    p = jnp.exp(s - m_new)
    l_scr[...] = alpha * l_scr[...] + jnp.sum(p, axis=-1, keepdims=True)
    acc_scr[...] = alpha * acc_scr[...] + jnp.einsum(
        'hqk,hkd->hqd', p.astype(jnp.bfloat16), v_ref[0],
        preferred_element_type=jnp.float32)
    m_scr[...] = m_new

    @pl.when(kv == pl.num_programs(2) - 1)
    def _finalize():
        dh = acc_scr.shape[-1]
        z = acc_scr[...] * pl.reciprocal(l_scr[...], approx=True)   # (H, bq, dh)
        # combine_heads once per q-tile into a lane-packed (bq, D) slab, then a
        # single full-D W_o contraction (no (H, bq, D) intermediate).
        for h in range(n_heads):
            zc_scr[:, h * dh:(h + 1) * dh] = z[h].astype(jnp.bfloat16)
        attn = jnp.dot(zc_scr[...], wo_ref[...],
                       preferred_element_type=jnp.float32) + bo_ref[...]
        # dropout1 is identity (inference semantics).
        out_ref[0] = _layer_norm(attn + xres_ref[0]).astype(out_ref.dtype)


def attention_pallas(q, k, v, keep, x, wo, bo, *, n_heads, block_q, block_kv):
    B, H, S, dh = q.shape
    D = H * dh
    grid = (B, S // block_q, S // block_kv)
    return pl.pallas_call(
        functools.partial(_attention_kernel, n_heads=n_heads),
        out_shape=jax.ShapeDtypeStruct((B, S, D), x.dtype),
        grid=grid,
        in_specs=[
            pl.BlockSpec((1, H, block_q, dh), lambda b, qi, ki: (b, 0, qi, 0)),
            pl.BlockSpec((1, H, block_kv, dh), lambda b, qi, ki: (b, 0, ki, 0)),
            pl.BlockSpec((1, H, block_kv, dh), lambda b, qi, ki: (b, 0, ki, 0)),
            pl.BlockSpec((1, block_q, block_kv), lambda b, qi, ki: (b, qi, ki)),
            pl.BlockSpec((1, block_q, D), lambda b, qi, ki: (b, qi, 0)),   # residual x
            _const_spec((D, D)), _const_spec((1, D)),                       # W_o, b_o
        ],
        out_specs=pl.BlockSpec((1, block_q, D), lambda b, qi, ki: (b, qi, 0)),
        scratch_shapes=[
            pltpu.VMEM((H, block_q, 1), jnp.float32),    # running max
            pltpu.VMEM((H, block_q, 1), jnp.float32),    # running sum
            pltpu.VMEM((H, block_q, dh), jnp.float32),   # output accumulator
            pltpu.VMEM((block_q, D), jnp.bfloat16),      # combined-heads slab
        ],
        compiler_params=pltpu.CompilerParams(
            dimension_semantics=("parallel", "parallel", "arbitrary"),
            vmem_limit_bytes=_vmem_limit_bytes()),
    )(q, k, v, keep, x, wo, bo)


# ----------------------------- kernel 3: FFN + LN2 -----------------------------
def _ffn_kernel(x1_ref, w1_ref, b1_ref, w2_ref, b2_ref, out_ref, acc_scr):
    f = pl.program_id(2)

    @pl.when(f == 0)
    def _init():
        acc_scr[...] = jnp.zeros(acc_scr.shape, dtype=acc_scr.dtype)

    x1 = x1_ref[0].astype(jnp.bfloat16)                      # (ts, D)
    h = jnp.dot(x1, w1_ref[...], preferred_element_type=jnp.float32) + b1_ref[...]
    h = jnp.maximum(h, 0.0).astype(jnp.bfloat16)
    acc_scr[...] += jnp.dot(h, w2_ref[...], preferred_element_type=jnp.float32)

    @pl.when(f == pl.num_programs(2) - 1)
    def _finalize():
        ffn = acc_scr[...] + b2_ref[...]
        # dropout2 is identity (inference semantics).
        out_ref[0] = _layer_norm(ffn + x1_ref[0]).astype(out_ref.dtype)


def ffn_pallas(x1, w1, b1, w2, b2, *, block_s, block_f):
    B, S, D = x1.shape
    F = w1.shape[1]
    grid = (B, S // block_s, F // block_f)
    return pl.pallas_call(
        _ffn_kernel,
        out_shape=jax.ShapeDtypeStruct((B, S, D), x1.dtype),
        grid=grid,
        in_specs=[
            pl.BlockSpec((1, block_s, D), lambda b, s, f: (b, s, 0)),
            pl.BlockSpec((D, block_f), lambda b, s, f: (0, f)),     # W1 tile
            pl.BlockSpec((1, block_f), lambda b, s, f: (0, f)),     # b1 tile
            pl.BlockSpec((block_f, D), lambda b, s, f: (f, 0)),     # W2 tile
            _const_spec((1, D)),                                    # b2
        ],
        out_specs=pl.BlockSpec((1, block_s, D), lambda b, s, f: (b, s, 0)),
        scratch_shapes=[pltpu.VMEM((block_s, D), jnp.float32)],
        compiler_params=pltpu.CompilerParams(
            dimension_semantics=("parallel", "parallel", "arbitrary"),
            vmem_limit_bytes=_vmem_limit_bytes()),
    )(x1, w1, b1, w2, b2)


# ----------------------------- per-layer wrapper -------------------------------
def encoder_layer_pallas(x, keep, params, *, n_heads, scale,
                         block_q=None, block_kv=None):
    B, S, D = x.shape
    F = params["w1"].shape[1]
    bq_def, bkv_def = _attention_blocks(S)
    block_q = bq_def if block_q is None else block_q
    block_kv = bkv_def if block_kv is None else block_kv
    assert S % block_q == 0 and S % block_kv == 0, "seq len must divide tiles"

    bf16 = jnp.bfloat16
    # Fold softmax scale into W_q / b_q (zero in-kernel cost).
    wq = (params["wq"] * scale).astype(bf16)
    bq = params["bq"] * scale
    wk = params["wk"].astype(bf16)
    wv = params["wv"].astype(bf16)
    wo = params["wo"].astype(bf16)
    w1 = params["w1"].astype(bf16)
    w2 = params["w2"].astype(bf16)

    q, k, v = qkv_proj_pallas(x, wq, bq, wk, params["bk"], wv, params["bv"],
                              n_heads=n_heads, block_s=block_q)
    x1 = attention_pallas(q, k, v, keep, x, wo, params["bo"],
                          n_heads=n_heads, block_q=block_q, block_kv=block_kv)

    block_s = min(S, 256)
    block_f = min(F, 512)
    assert S % block_s == 0 and F % block_f == 0
    return ffn_pallas(x1, w1, params["b1"], w2, params["b2"],
                      block_s=block_s, block_f=block_f)


# ------------------------------ glue (plain JAX) -------------------------------
def sinusoid_encoding(max_len, d_model):
    pos = np.arange(max_len, dtype=np.float32)[:, None]
    two_i = np.arange(0, d_model, 2, dtype=np.float32)
    enc = np.zeros((max_len, d_model), dtype=np.float32)
    enc[:, 0::2] = np.sin(pos / 10000 ** (two_i / d_model))
    enc[:, 1::2] = np.cos(pos / 10000 ** (two_i / d_model))
    return jnp.asarray(enc)


def init_layer_params(key, d_model, ffn_hidden):
    ks = jax.random.split(key, 6)
    s = 0.02
    return {
        "wq": s * jax.random.normal(ks[0], (d_model, d_model), jnp.float32),
        "bq": jnp.zeros((1, d_model), jnp.float32),
        "wk": s * jax.random.normal(ks[1], (d_model, d_model), jnp.float32),
        "bk": jnp.zeros((1, d_model), jnp.float32),
        "wv": s * jax.random.normal(ks[2], (d_model, d_model), jnp.float32),
        "bv": jnp.zeros((1, d_model), jnp.float32),
        "wo": s * jax.random.normal(ks[3], (d_model, d_model), jnp.float32),
        "bo": jnp.zeros((1, d_model), jnp.float32),
        "w1": s * jax.random.normal(ks[4], (d_model, ffn_hidden), jnp.float32),
        "b1": jnp.zeros((1, ffn_hidden), jnp.float32),
        "w2": s * jax.random.normal(ks[5], (ffn_hidden, d_model), jnp.float32),
        "b2": jnp.zeros((1, d_model), jnp.float32),
    }


def encoder_forward_pallas(tokens, mask, emb_table, pos_enc, layer_params,
                           *, n_heads, scale):
    B, S = tokens.shape
    # TransformerEmbedding: token lookup + sinusoidal positions (plain-JAX glue).
    x = jnp.take(emb_table, tokens, axis=0) + pos_enc[:S][None, :, :]
    # Compress the mask to int8 "keep" flags; only the (mask == 0) test matters.
    keep = (mask != 0).astype(jnp.int8)
    # TODO(synk): cross-layer weight prefetch (P10 semaphore/VMEM futures) not
    # implemented; each layer pays its own (small, tiled) weight DMA.
    for params in layer_params:
        x = encoder_layer_pallas(x, keep, params, n_heads=n_heads, scale=scale)
    return x


def encoder_forward_ref(tokens, mask, emb_table, pos_enc, layer_params,
                        *, n_heads, scale):
    """Pure-JAX f32 reference mirroring Encoder_torch.forward (eval mode)."""
    B, S = tokens.shape
    x = jnp.take(emb_table, tokens, axis=0) + pos_enc[:S][None, :, :]
    D = x.shape[-1]
    dh = D // n_heads

    def ln(t, eps=1e-12):
        mean = jnp.mean(t, axis=-1, keepdims=True)
        var = jnp.mean((t - mean) ** 2, axis=-1, keepdims=True)
        return (t - mean) / jnp.sqrt(var + eps)

    for p in layer_params:
        q = x @ p["wq"] + p["bq"]
        k = x @ p["wk"] + p["bk"]
        v = x @ p["wv"] + p["bv"]
        qh = q.reshape(B, S, n_heads, dh).transpose(0, 2, 1, 3)
        kh = k.reshape(B, S, n_heads, dh).transpose(0, 2, 1, 3)
        vh = v.reshape(B, S, n_heads, dh).transpose(0, 2, 1, 3)
        s = jnp.einsum("bhqd,bhkd->bhqk", qh, kh) * scale
        s = jnp.where(mask[:, None, :, :] == 0, -1000000000.0, s)
        probs = jax.nn.softmax(s, axis=-1)
        z = jnp.einsum("bhqk,bhkd->bhqd", probs, vh)
        z = z.transpose(0, 2, 1, 3).reshape(B, S, D)
        attn_out = z @ p["wo"] + p["bo"]
        x1 = ln(attn_out + x)
        h1 = jnp.maximum(x1 @ p["w1"] + p["b1"], 0.0)
        ffn_out = h1 @ p["w2"] + p["b2"]
        x = ln(ffn_out + x1)
    return x


# ----------------------------------- main --------------------------------------
if __name__ == "__main__":
    # small config
    B, S = 2, 8
    enc_voc_size, max_len = 50, 16
    d_model, d_k, n_heads = 32, 32, 4
    ffn_hidden, n_layers = 64, 2
    scale = 1.0 / math.sqrt(d_k / n_heads)   # torch: 1/sqrt(d_k / num_heads)

    key = jax.random.PRNGKey(0)
    k_tok, k_emb, k_layers = jax.random.split(key, 3)

    tokens = jax.random.randint(k_tok, (B, S), 0, enc_voc_size, dtype=jnp.int32)
    emb_table = 0.02 * jax.random.normal(k_emb, (enc_voc_size, d_model), jnp.float32)
    pos_enc = sinusoid_encoding(max_len, d_model)

    # mask: [B, S, S]; mask the last two key positions of batch element 1
    mask = jnp.ones((B, S, S), jnp.float32)
    mask = mask.at[1, :, -2:].set(0.0)

    layer_keys = jax.random.split(k_layers, n_layers)
    layer_params = [init_layer_params(lk, d_model, ffn_hidden) for lk in layer_keys]

    out = encoder_forward_pallas(tokens, mask, emb_table, pos_enc, layer_params,
                                 n_heads=n_heads, scale=scale)
    out = jax.block_until_ready(out)

    ref = encoder_forward_ref(tokens, mask, emb_table, pos_enc, layer_params,
                              n_heads=n_heads, scale=scale)
    # Kernels use bf16 matmul operands (f32 accumulation) + approx reciprocal,
    # so compare against the pure-f32 reference with a bf16-appropriate tolerance.
    np.testing.assert_allclose(np.asarray(out), np.asarray(ref),
                               rtol=2e-2, atol=2e-2)

    print("KERNEL_OK")
</pallas_src>

<mosaic_0001>
module attributes {stable_mosaic.version = 11 : i64} {
  func.func @_qkv_proj_kernel(%arg0: i32, %arg1: i32, %arg2: memref<1x8x32xf32, #tpu.memory_space<vmem>>, %arg3: memref<32x32xbf16, #tpu.memory_space<vmem>>, %arg4: memref<1x32xf32, #tpu.memory_space<vmem>>, %arg5: memref<32x32xbf16, #tpu.memory_space<vmem>>, %arg6: memref<1x32xf32, #tpu.memory_space<vmem>>, %arg7: memref<32x32xbf16, #tpu.memory_space<vmem>>, %arg8: memref<1x32xf32, #tpu.memory_space<vmem>>, %arg9: memref<1x4x8x8xbf16, #tpu.memory_space<vmem>>, %arg10: memref<1x4x8x8xbf16, #tpu.memory_space<vmem>>, %arg11: memref<1x4x8x8xbf16, #tpu.memory_space<vmem>>) attributes {dimension_semantics = [#tpu.dimension_semantics<parallel>, #tpu.dimension_semantics<parallel>], iteration_bounds = array<i64: 2, 1>, scalar_prefetch = 0 : i64, scratch_operands = 0 : i64, tpu.core_type = #tpu.core_type<tc>, window_params = [{transform_indices = @transform_0, window_bounds = array<i64: 1, 8, 32>}, {pipeline_mode = #tpu.pipeline_mode<synchronous>, transform_indices = @transform_1, window_bounds = array<i64: 32, 32>}, {pipeline_mode = #tpu.pipeline_mode<synchronous>, transform_indices = @transform_2, window_bounds = array<i64: 1, 32>}, {pipeline_mode = #tpu.pipeline_mode<synchronous>, transform_indices = @transform_3, window_bounds = array<i64: 32, 32>}, {pipeline_mode = #tpu.pipeline_mode<synchronous>, transform_indices = @transform_4, window_bounds = array<i64: 1, 32>}, {pipeline_mode = #tpu.pipeline_mode<synchronous>, transform_indices = @transform_5, window_bounds = array<i64: 32, 32>}, {pipeline_mode = #tpu.pipeline_mode<synchronous>, transform_indices = @transform_6, window_bounds = array<i64: 1, 32>}, {transform_indices = @transform_7, window_bounds = array<i64: 1, 4, 8, 8>}, {transform_indices = @transform_8, window_bounds = array<i64: 1, 4, 8, 8>}, {transform_indices = @transform_9, window_bounds = array<i64: 1, 4, 8, 8>}]} {
    %c0 = arith.constant 0 : index
    %c0_0 = arith.constant 0 : index
    %c0_1 = arith.constant 0 : index
    %0 = vector.load %arg2[%c0, %c0_0, %c0_1] : memref<1x8x32xf32, #tpu.memory_space<vmem>>, vector<1x8x32xf32>
    %1 = vector.shape_cast %0 : vector<1x8x32xf32> to vector<8x32xf32>
    %2 = arith.truncf %1 : vector<8x32xf32> to vector<8x32xbf16>
    %c0_2 = arith.constant 0 : index
    %c0_3 = arith.constant 0 : index
    %3 = vector.load %arg3[%c0_2, %c0_3] : memref<32x32xbf16, #tpu.memory_space<vmem>>, vector<32x32xbf16>
    %cst = arith.constant dense<0.000000e+00> : vector<8x32xf32>
    %4 = tpu.matmul %2, %3, %cst {dimension_numbers = #tpu.dot_dimension_numbers<[1], [0], [0], [1], [0, 0, 1, 1], [], []>} : vector<8x32xbf16>, vector<32x32xbf16>, vector<8x32xf32> -> vector<8x32xf32>
    %c0_4 = arith.constant 0 : index
    %c0_5 = arith.constant 0 : index
    %5 = vector.load %arg4[%c0_4, %c0_5] : memref<1x32xf32, #tpu.memory_space<vmem>>, vector<1x32xf32>
    %6 = vector.broadcast %5 : vector<1x32xf32> to vector<8x32xf32>
    %7 = arith.addf %4, %6 : vector<8x32xf32>
    %c0_6 = arith.constant 0 : index
    %c0_7 = arith.constant 0 : index
    %8 = vector.load %arg5[%c0_6, %c0_7] : memref<32x32xbf16, #tpu.memory_space<vmem>>, vector<32x32xbf16>
    %cst_8 = arith.constant dense<0.000000e+00> : vector<8x32xf32>
    %9 = tpu.matmul %2, %8, %cst_8 {dimension_numbers = #tpu.dot_dimension_numbers<[1], [0], [0], [1], [0, 0, 1, 1], [], []>} : vector<8x32xbf16>, vector<32x32xbf16>, vector<8x32xf32> -> vector<8x32xf32>
    %c0_9 = arith.constant 0 : index
    %c0_10 = arith.constant 0 : index
    %10 = vector.load %arg6[%c0_9, %c0_10] : memref<1x32xf32, #tpu.memory_space<vmem>>, vector<1x32xf32>
    %11 = vector.broadcast %10 : vector<1x32xf32> to vector<8x32xf32>
    %12 = arith.addf %9, %11 : vector<8x32xf32>
    %c0_11 = arith.constant 0 : index
    %c0_12 = arith.constant 0 : index
    %13 = vector.load %arg7[%c0_11, %c0_12] : memref<32x32xbf16, #tpu.memory_space<vmem>>, vector<32x32xbf16>
    %cst_13 = arith.constant dense<0.000000e+00> : vector<8x32xf32>
    %14 = tpu.matmul %2, %13, %cst_13 {dimension_numbers = #tpu.dot_dimension_numbers<[1], [0], [0], [1], [0, 0, 1, 1], [], []>} : vector<8x32xbf16>, vector<32x32xbf16>, vector<8x32xf32> -> vector<8x32xf32>
    %c0_14 = arith.constant 0 : index
    %c0_15 = arith.constant 0 : index
    %15 = vector.load %arg8[%c0_14, %c0_15] : memref<1x32xf32, #tpu.memory_space<vmem>>, vector<1x32xf32>
    %16 = vector.broadcast %15 : vector<1x32xf32> to vector<8x32xf32>
    %17 = arith.addf %14, %16 : vector<8x32xf32>
    %18 = vector.extract_strided_slice %7 {offsets = [0, 0], sizes = [8, 8], strides = [1, 1]} : vector<8x32xf32> to vector<8x8xf32>
    %19 = arith.truncf %18 : vector<8x8xf32> to vector<8x8xbf16>
    %c0_16 = arith.constant 0 : index
    %c0_17 = arith.constant 0 : index
    %c0_18 = arith.constant 0 : index
    %c0_19 = arith.constant 0 : index
    %20 = vector.load %arg9[%c0_16, %c0_17, %c0_18, %c0_19] : memref<1x4x8x8xbf16, #tpu.memory_space<vmem>>, vector<1x1x8x8xbf16>
    %21 = vector.shape_cast %20 : vector<1x1x8x8xbf16> to vector<8x8xbf16>
    %22 = vector.shape_cast %19 : vector<8x8xbf16> to vector<1x1x8x8xbf16>
    tpu.vector_store %arg9[%c0_16, %c0_17, %c0_18, %c0_19], %22 {strides = array<i32>} : memref<1x4x8x8xbf16, #tpu.memory_space<vmem>>, vector<1x1x8x8xbf16>,
    %23 = vector.extract_strided_slice %12 {offsets = [0, 0], sizes = [8, 8], strides = [1, 1]} : vector<8x32xf32> to vector<8x8xf32>
    %24 = arith.truncf %23 : vector<8x8xf32> to vector<8x8xbf16>
    %c0_20 = arith.constant 0 : index
    %c0_21 = arith.constant 0 : index
    %c0_22 = arith.constant 0 : index
    %c0_23 = arith.constant 0 : index
    %25 = vector.load %arg10[%c0_20, %c0_21, %c0_22, %c0_23] : memref<1x4x8x8xbf16, #tpu.memory_space<vmem>>, vector<1x1x8x8xbf16>
    %26 = vector.shape_cast %25 : vector<1x1x8x8xbf16> to vector<8x8xbf16>
    %27 = vector.shape_cast %24 : vector<8x8xbf16> to vector<1x1x8x8xbf16>
    tpu.vector_store %arg10[%c0_20, %c0_21, %c0_22, %c0_23], %27 {strides = array<i32>} : memref<1x4x8x8xbf16, #tpu.memory_space<vmem>>, vector<1x1x8x8xbf16>,
    %28 = vector.extract_strided_slice %17 {offsets = [0, 0], sizes = [8, 8], strides = [1, 1]} : vector<8x32xf32> to vector<8x8xf32>
    %29 = arith.truncf %28 : vector<8x8xf32> to vector<8x8xbf16>
    %c0_24 = arith.constant 0 : index
    %c0_25 = arith.constant 0 : index
    %c0_26 = arith.constant 0 : index
    %c0_27 = arith.constant 0 : index
    %30 = vector.load %arg11[%c0_24, %c0_25, %c0_26, %c0_27] : memref<1x4x8x8xbf16, #tpu.memory_space<vmem>>, vector<1x1x8x8xbf16>
    %31 = vector.shape_cast %30 : vector<1x1x8x8xbf16> to vector<8x8xbf16>
    %32 = vector.shape_cast %29 : vector<8x8xbf16> to vector<1x1x8x8xbf16>
    tpu.vector_store %arg11[%c0_24, %c0_25, %c0_26, %c0_27], %32 {strides = array<i32>} : memref<1x4x8x8xbf16, #tpu.memory_space<vmem>>, vector<1x1x8x8xbf16>,
    %33 = vector.extract_strided_slice %7 {offsets = [0, 8], sizes = [8, 8], strides = [1, 1]} : vector<8x32xf32> to vector<8x8xf32>
    %34 = arith.truncf %33 : vector<8x8xf32> to vector<8x8xbf16>
    %c0_28 = arith.constant 0 : index
    %c1 = arith.constant 1 : index
    %c0_29 = arith.constant 0 : index
    %c0_30 = arith.constant 0 : index
    %35 = vector.load %arg9[%c0_28, %c1, %c0_29, %c0_30] : memref<1x4x8x8xbf16, #tpu.memory_space<vmem>>, vector<1x1x8x8xbf16>
    %36 = vector.shape_cast %35 : vector<1x1x8x8xbf16> to vector<8x8xbf16>
    %37 = vector.shape_cast %34 : vector<8x8xbf16> to vector<1x1x8x8xbf16>
    tpu.vector_store %arg9[%c0_28, %c1, %c0_29, %c0_30], %37 {strides = array<i32>} : memref<1x4x8x8xbf16, #tpu.memory_space<vmem>>, vector<1x1x8x8xbf16>,
    %38 = vector.extract_strided_slice %12 {offsets = [0, 8], sizes = [8, 8], strides = [1, 1]} : vector<8x32xf32> to vector<8x8xf32>
    %39 = arith.truncf %38 : vector<8x8xf32> to vector<8x8xbf16>
    %c0_31 = arith.constant 0 : index
    %c1_32 = arith.constant 1 : index
    %c0_33 = arith.constant 0 : index
    %c0_34 = arith.constant 0 : index
    %40 = vector.load %arg10[%c0_31, %c1_32, %c0_33, %c0_34] : memref<1x4x8x8xbf16, #tpu.memory_space<vmem>>, vector<1x1x8x8xbf16>
    %41 = vector.shape_cast %40 : vector<1x1x8x8xbf16> to vector<8x8xbf16>
    %42 = vector.shape_cast %39 : vector<8x8xbf16> to vector<1x1x8x8xbf16>
    tpu.vector_store %arg10[%c0_31, %c1_32, %c0_33, %c0_34], %42 {strides = array<i32>} : memref<1x4x8x8xbf16, #tpu.memory_space<vmem>>, vector<1x1x8x8xbf16>,
    %43 = vector.extract_strided_slice %17 {offsets = [0, 8], sizes = [8, 8], strides = [1, 1]} : vector<8x32xf32> to vector<8x8xf32>
    %44 = arith.truncf %43 : vector<8x8xf32> to vector<8x8xbf16>
    %c0_35 = arith.constant 0 : index
    %c1_36 = arith.constant 1 : index
    %c0_37 = arith.constant 0 : index
    %c0_38 = arith.constant 0 : index
    %45 = vector.load %arg11[%c0_35, %c1_36, %c0_37, %c0_38] : memref<1x4x8x8xbf16, #tpu.memory_space<vmem>>, vector<1x1x8x8xbf16>
    %46 = vector.shape_cast %45 : vector<1x1x8x8xbf16> to vector<8x8xbf16>
    %47 = vector.shape_cast %44 : vector<8x8xbf16> to vector<1x1x8x8xbf16>
    tpu.vector_store %arg11[%c0_35, %c1_36, %c0_37, %c0_38], %47 {strides = array<i32>} : memref<1x4x8x8xbf16, #tpu.memory_space<vmem>>, vector<1x1x8x8xbf16>,
    %48 = vector.extract_strided_slice %7 {offsets = [0, 16], sizes = [8, 8], strides = [1, 1]} : vector<8x32xf32> to vector<8x8xf32>
    %49 = arith.truncf %48 : vector<8x8xf32> to vector<8x8xbf16>
    %c0_39 = arith.constant 0 : index
    %c2 = arith.constant 2 : index
    %c0_40 = arith.constant 0 : index
    %c0_41 = arith.constant 0 : index
    %50 = vector.load %arg9[%c0_39, %c2, %c0_40, %c0_41] : memref<1x4x8x8xbf16, #tpu.memory_space<vmem>>, vector<1x1x8x8xbf16>
    %51 = vector.shape_cast %50 : vector<1x1x8x8xbf16> to vector<8x8xbf16>
    %52 = vector.shape_cast %49 : vector<8x8xbf16> to vector<1x1x8x8xbf16>
    tpu.vector_store %arg9[%c0_39, %c2, %c0_40, %c0_41], %52 {strides = array<i32>} : memref<1x4x8x8xbf16, #tpu.memory_space<vmem>>, vector<1x1x8x8xbf16>,
    %53 = vector.extract_strided_slice %12 {offsets = [0, 16], sizes = [8, 8], strides = [1, 1]} : vector<8x32xf32> to vector<8x8xf32>
    %54 = arith.truncf %53 : vector<8x8xf32> to vector<8x8xbf16>
    %c0_42 = arith.constant 0 : index
    %c2_43 = arith.constant 2 : index
    %c0_44 = arith.constant 0 : index
    %c0_45 = arith.constant 0 : index
    %55 = vector.load %arg10[%c0_42, %c2_43, %c0_44, %c0_45] : memref<1x4x8x8xbf16, #tpu.memory_space<vmem>>, vector<1x1x8x8xbf16>
    %56 = vector.shape_cast %55 : vector<1x1x8x8xbf16> to vector<8x8xbf16>
    %57 = vector.shape_cast %54 : vector<8x8xbf16> to vector<1x1x8x8xbf16>
    tpu.vector_store %arg10[%c0_42, %c2_43, %c0_44, %c0_45], %57 {strides = array<i32>} : memref<1x4x8x8xbf16, #tpu.memory_space<vmem>>, vector<1x1x8x8xbf16>,
    %58 = vector.extract_strided_slice %17 {offsets = [0, 16], sizes = [8, 8], strides = [1, 1]} : vector<8x32xf32> to vector<8x8xf32>
    %59 = arith.truncf %58 : vector<8x8xf32> to vector<8x8xbf16>
    %c0_46 = arith.constant 0 : index
    %c2_47 = arith.constant 2 : index
    %c0_48 = arith.constant 0 : index
    %c0_49 = arith.constant 0 : index
    %60 = vector.load %arg11[%c0_46, %c2_47, %c0_48, %c0_49] : memref<1x4x8x8xbf16, #tpu.memory_space<vmem>>, vector<1x1x8x8xbf16>
    %61 = vector.shape_cast %60 : vector<1x1x8x8xbf16> to vector<8x8xbf16>
    %62 = vector.shape_cast %59 : vector<8x8xbf16> to vector<1x1x8x8xbf16>
    tpu.vector_store %arg11[%c0_46, %c2_47, %c0_48, %c0_49], %62 {strides = array<i32>} : memref<1x4x8x8xbf16, #tpu.memory_space<vmem>>, vector<1x1x8x8xbf16>,
    %63 = vector.extract_strided_slice %7 {offsets = [0, 24], sizes = [8, 8], strides = [1, 1]} : vector<8x32xf32> to vector<8x8xf32>
    %64 = arith.truncf %63 : vector<8x8xf32> to vector<8x8xbf16>
    %c0_50 = arith.constant 0 : index
    %c3 = arith.constant 3 : index
    %c0_51 = arith.constant 0 : index
    %c0_52 = arith.constant 0 : index
    %65 = vector.load %arg9[%c0_50, %c3, %c0_51, %c0_52] : memref<1x4x8x8xbf16, #tpu.memory_space<vmem>>, vector<1x1x8x8xbf16>
    %66 = vector.shape_cast %65 : vector<1x1x8x8xbf16> to vector<8x8xbf16>
    %67 = vector.shape_cast %64 : vector<8x8xbf16> to vector<1x1x8x8xbf16>
    tpu.vector_store %arg9[%c0_50, %c3, %c0_51, %c0_52], %67 {strides = array<i32>} : memref<1x4x8x8xbf16, #tpu.memory_space<vmem>>, vector<1x1x8x8xbf16>,
    %68 = vector.extract_strided_slice %12 {offsets = [0, 24], sizes = [8, 8], strides = [1, 1]} : vector<8x32xf32> to vector<8x8xf32>
    %69 = arith.truncf %68 : vector<8x8xf32> to vector<8x8xbf16>
    %c0_53 = arith.constant 0 : index
    %c3_54 = arith.constant 3 : index
    %c0_55 = arith.constant 0 : index
    %c0_56 = arith.constant 0 : index
    %70 = vector.load %arg10[%c0_53, %c3_54, %c0_55, %c0_56] : memref<1x4x8x8xbf16, #tpu.memory_space<vmem>>, vector<1x1x8x8xbf16>
    %71 = vector.shape_cast %70 : vector<1x1x8x8xbf16> to vector<8x8xbf16>
    %72 = vector.shape_cast %69 : vector<8x8xbf16> to vector<1x1x8x8xbf16>
    tpu.vector_store %arg10[%c0_53, %c3_54, %c0_55, %c0_56], %72 {strides = array<i32>} : memref<1x4x8x8xbf16, #tpu.memory_space<vmem>>, vector<1x1x8x8xbf16>,
    %73 = vector.extract_strided_slice %17 {offsets = [0, 24], sizes = [8, 8], strides = [1, 1]} : vector<8x32xf32> to vector<8x8xf32>
    %74 = arith.truncf %73 : vector<8x8xf32> to vector<8x8xbf16>
    %c0_57 = arith.constant 0 : index
    %c3_58 = arith.constant 3 : index
    %c0_59 = arith.constant 0 : index
    %c0_60 = arith.constant 0 : index
    %75 = vector.load %arg11[%c0_57, %c3_58, %c0_59, %c0_60] : memref<1x4x8x8xbf16, #tpu.memory_space<vmem>>, vector<1x1x8x8xbf16>
    %76 = vector.shape_cast %75 : vector<1x1x8x8xbf16> to vector<8x8xbf16>
    %77 = vector.shape_cast %74 : vector<8x8xbf16> to vector<1x1x8x8xbf16>
    tpu.vector_store %arg11[%c0_57, %c3_58, %c0_59, %c0_60], %77 {strides = array<i32>} : memref<1x4x8x8xbf16, #tpu.memory_space<vmem>>, vector<1x1x8x8xbf16>,
    return
  }
  func.func @transform_0(%arg0: i32, %arg1: i32) -> (i32, i32, i32) {
    %c0_i32 = arith.constant 0 : i32
    %c0_i32_0 = arith.constant 0 : i32
    return %arg0, %arg1, %c0_i32 : i32, i32, i32
  }
  func.func @transform_1(%arg0: i32, %arg1: i32) -> (i32, i32) {
    %c0_i32 = arith.constant 0 : i32
    %c0_i32_0 = arith.constant 0 : i32
    %c0_i32_1 = arith.constant 0 : i32
    return %c0_i32, %c0_i32_0 : i32, i32
  }
  func.func @transform_2(%arg0: i32, %arg1: i32) -> (i32, i32) {
    %c0_i32 = arith.constant 0 : i32
    %c0_i32_0 = arith.constant 0 : i32
    %c0_i32_1 = arith.constant 0 : i32
    return %c0_i32, %c0_i32_0 : i32, i32
  }
  func.func @transform_3(%arg0: i32, %arg1: i32) -> (i32, i32) {
    %c0_i32 = arith.constant 0 : i32
    %c0_i32_0 = arith.constant 0 : i32
    %c0_i32_1 = arith.constant 0 : i32
    return %c0_i32, %c0_i32_0 : i32, i32
  }
  func.func @transform_4(%arg0: i32, %arg1: i32) -> (i32, i32) {
    %c0_i32 = arith.constant 0 : i32
    %c0_i32_0 = arith.constant 0 : i32
    %c0_i32_1 = arith.constant 0 : i32
    return %c0_i32, %c0_i32_0 : i32, i32
  }
  func.func @transform_5(%arg0: i32, %arg1: i32) -> (i32, i32) {
    %c0_i32 = arith.constant 0 : i32
    %c0_i32_0 = arith.constant 0 : i32
    %c0_i32_1 = arith.constant 0 : i32
    return %c0_i32, %c0_i32_0 : i32, i32
  }
  func.func @transform_6(%arg0: i32, %arg1: i32) -> (i32, i32) {
    %c0_i32 = arith.constant 0 : i32
    %c0_i32_0 = arith.constant 0 : i32
    %c0_i32_1 = arith.constant 0 : i32
    return %c0_i32, %c0_i32_0 : i32, i32
  }
  func.func @transform_7(%arg0: i32, %arg1: i32) -> (i32, i32, i32, i32) {
    %c0_i32 = arith.constant 0 : i32
    %c0_i32_0 = arith.constant 0 : i32
    %c0_i32_1 = arith.constant 0 : i32
    return %arg0, %c0_i32, %arg1, %c0_i32_0 : i32, i32, i32, i32
  }
  func.func @transform_8(%arg0: i32, %arg1: i32) -> (i32, i32, i32, i32) {
    %c0_i32 = arith.constant 0 : i32
    %c0_i32_0 = arith.constant 0 : i32
    %c0_i32_1 = arith.constant 0 : i32
    return %arg0, %c0_i32, %arg1, %c0_i32_0 : i32, i32, i32, i32
  }
  func.func @transform_9(%arg0: i32, %arg1: i32) -> (i32, i32, i32, i32) {
    %c0_i32 = arith.constant 0 : i32
    %c0_i32_0 = arith.constant 0 : i32
    %c0_i32_1 = arith.constant 0 : i32
    return %arg0, %c0_i32, %arg1, %c0_i32_0 : i32, i32, i32, i32
  }
}

</mosaic_0001>

<bundles_post_ra>
// kernel: tpu_custom_call.1
= control target key start
LH: loop header
LB: loop body
LE: loop exit
PB: predicated region body
PF: predicated region fallthrough
CT: control target
= control target key end

     0   :  { %s1632_s0 = inlined_call_operand.hbm [shape: f32[2,8,32], index: 0, kind: input, shape index: {}]   ;;  %s1633_s1 = inlined_call_operand.hbm [shape: bf16[32,32], index: 1, kind: input, shape index: {}]   ;;  %s1634_s2 = inlined_call_operand.vmem [shape: f32[1,32], index: 2, kind: input, shape index: {}]   ;;  %s1635_s3 = inlined_call_operand.hbm [shape: bf16[32,32], index: 3, kind: input, shape index: {}]   ;;  %s1636_s4 = inlined_call_operand.vmem [shape: f32[1,32], index: 4, kind: input, shape index: {}]   ;;  %s1637_s5 = inlined_call_operand.hbm [shape: bf16[32,32], index: 5, kind: input, shape index: {}]   ;;  %s1638_s6 = inlined_call_operand.vmem [shape: f32[1,32], index: 6, kind: input, shape index: {}]   ;;  %s1639_s7 = inlined_call_operand.hbm [shape: bf16[2,4,8,8], index: 7, kind: output, shape index: {0}]   ;;  %s1640_s8 = inlined_call_operand.hbm [shape: bf16[2,4,8,8], index: 8, kind: output, shape index: {1}]   ;;  %s1641_s9 = inlined_call_operand.hbm [shape: bf16[2,4,8,8], index: 9, kind: output, shape index: {2}]  }
   0x1   :  { %1644 = sst [smem:[#allocation20_spill]] %s1632_s0 }
   0x2   :  { %1645 = sst [smem:[#allocation21_spill]] %s1633_s1 }
   0x3   :  { %1646 = sst [smem:[#allocation22_spill]] %s1634_s2 }
   0x4   :  { %1647 = sst [smem:[#allocation23_spill]] %s1635_s3 }
   0x5   :  { %1648 = sst [smem:[#allocation24_spill]] %s1636_s4 }
   0x6   :  { %1649 = sst [smem:[#allocation25_spill]] %s1637_s5 }
   0x7   :  { %1650 = sst [smem:[#allocation26_spill]] %s1638_s6 }
   0x8   :  { %15 = vsyncpa [#allocation3], 0 }
   0x9   :  { %17 = vsyncpa [#allocation3 + $0x1], 0 }
   0xa   :  { %18 = vsyncpa [#allocation6], 0 }
   0xb   :  { %19 = vsyncpa [#allocation9], 0 }
   0xc   :  { %20 = vsyncpa [#allocation4], 0 }
   0xd   :  { %22 = vsyncpa [#allocation4 + $0x1], 0 }
   0xe   :  { %23 = vsyncpa [#allocation12], 0 }
   0xf   :  { %25 = vsyncpa [#allocation12 + $0x1], 0  ;;  %s1361_s30 = smov 0   ;;  %s1363_s10 = smov 0  }
  0x10   :  { %s1365_s11 = smov 0   ;;  %s1367_s12 = smov 0  }
  0x11   :  { %s1369_s13 = smov 0   ;;  %s1371_s14 = smov 0  }
  0x12 LB: > { %s1392_s15 = sadd.s32 4294967295, %s1299_s14   ;;  %p845_p0 = scmp.ge.s32.totalorder %s1299_s14, 1  ;;  %s1299_s14 = sphi %s1371_s14, %s31_s14   ;;  %s1295_s13 = sphi %s1369_s13, %s1671_s13   ;;  %s1291_s12 = sphi %s1367_s12, %s1670_s12   ;;  %s1287_s11 = sphi %s1365_s11, %s1669_s11   ;;  %s1283_s10 = sphi %s1363_s10, %s1668_s10   ;;  %s1279_s30 = sphi %s1361_s30, %s1667_s30  }
  0x13   : > { %p66_p1 = scmp.eq.s32.totalorder %s1392_s15, 0  ;;  %p286_p2 = scmp.lt.s32.totalorder %s1299_s14, 3 }
  0x14   : > { %s1651_s1 = sld [smem:[#allocation21_spill]]  ;;  %s1301_s20 = smov [#allocation5]  }
  0x15   : > { %p1400_p3 = pnand %p845_p0, %p286_p2  ;;  %s299_s21 = sshll.u32 %s1301_s20, 4  ;;  %s300_s21 = int_to_ptr.vmem [resolvable:$true] %s299_s21 }
  0x16   : > { %p849_p6 = scmp.ge.s32.totalorder %s1299_s14, 2  ;;  %s1654_s3 = sld [smem:[#allocation23_spill]] }
  0x17   : > { %p936_p4 = pneg %p1400_p3  ;;  %s1302_s26 = smov 64  }
  0x18   : > { %s1303_s27 = smov 4   ;;  %s1304_s28 = smov [#allocation7]  }
  0x19   : > { %p1408_p5 = pnand %p936_p4, %p66_p1  ;;  %s316_s29 = sshll.u32 %s1304_s28, 4  ;;  %s317_s29 = int_to_ptr.vmem [resolvable:$true] %s316_s29 }
  0x1a   : > { %s297_s18 = sshll.u32 %s1651_s1, 4  ;;  %s1655_s5 = sld [smem:[#allocation25_spill]]  ;;  %s298_s18 = int_to_ptr.hbm [resolvable:$true] %s297_s18 }
  0x1b   : > { %939 = dma.hbm_to_vmem [thread:$0]  (!%p1408_p5), %s298_s18, 256, %s300_s21, [#allocation6], %s1302_s26, %s1302_s26, %s1303_s27  }
  0x1c   : > { %s314_s25 = sshll.u32 %s1654_s3, 4  ;;  %s1305_s23 = smov [#allocation8]   ;;  %s315_s25 = int_to_ptr.hbm [resolvable:$true] %s314_s25 }
  0x1d   : > { %942 = dma.hbm_to_vmem [thread:$0]  (!%p1408_p5), %s315_s25, 256, %s317_s29, [#allocation6], %s1302_s26, %s1302_s26, %s1303_s27  }
  0x1e   : > { %s333_s24 = sshll.u32 %s1305_s23, 4  ;;  %s1642_s18 = sadd.s32 4294967294, %s1299_s14   ;;  %s334_s24 = int_to_ptr.vmem [resolvable:$true] %s333_s24 }
  0x1f   : > { %s43_s21 = sadd.s32 1, %s1295_s13  ;;  %s52_s28 = sadd.s32 1, %s1287_s11 }
  0x20   : > { %s331_s20 = sshll.u32 %s1655_s5, 4  ;;  %p45_p7 = scmp.ge.s32.totalorder %s43_s21, 2  ;;  %s332_s20 = int_to_ptr.hbm [resolvable:$true] %s331_s20 }
  0x21   : > { %945 = dma.hbm_to_vmem [thread:$0]  (!%p1408_p5), %s332_s20, 256, %s334_s24, [#allocation9], %s1302_s26, %s1302_s26, %s1303_s27  }
  0x22   : > { %p59_p8 = scmp.ne.s32.totalorder %s1287_s11, %s1283_s10  ;;  %p60_p9 = scmp.eq.s32.totalorder %s1299_s14, 0 }
  0x23   : > { %p65_p10 = scmp.ne.s32.totalorder %s1283_s10, %s1279_s30  ;;  %s1673_s21 = smov (%p45_p7, %s43_s21), 0 }
  0x24   : > { %1656 = sst [smem:[#allocation19_spill]] %s1673_s21  ;;  %p1435_p11 = por %p60_p9, %p59_p8 }
  0x25   : > { %p1441_p12 = por %p66_p1, %p65_p10  ;;  %s47_s26 = ssub.s32 %s1295_s13, %s1673_s21 }
  0x26   : > { %p217_p13 = scmp.eq.s32.totalorder %s1392_s15, 1  ;;  %p50_p0 = scmp.eq.s32.totalorder %s47_s26, 0 }
  0x27   : > { %p223_p2 = scmp.eq.s32.totalorder %s1642_s18, 1  ;;  %p963_p5 = scmp.lt.s32.totalorder %s1299_s14, 2 }
  0x28   : > { %p1450_p4 = por %p217_p13, %p59_p8  ;;  %s350_s17 = sand.u32 1, %s1287_s11  }
  0x29   : > { %s1456_s29 = scalar_select %p50_p0, %s1287_s11, %s52_s28  }
  0x2a   : > { %p1458_p7 = por %p223_p2, %p65_p10  ;;  %s850_s20 = sshll.u32 %s350_s17, 3 }
  0x2b   : > { %s851_s23 = sshll.u32 %s1295_s13, 3  ;;  %s1661_s0 = sld [smem:[#allocation20_spill]] }
  0x2c   : > { %s354_s3 = scalar_lea.vmem [#allocation2], %s850_s20  ;;  %p947_p8 = pnand %p963_p5, %p1435_p11 }
  0x2d   : > { %s363_s18 = sshll.u32 %s354_s3, 4  ;;  %s351_s28 = scalar_lea.sflag [#allocation3], %s350_s17  ;;  %s364_s18 = int_to_ptr.vmem [resolvable:$true] %s363_s18 }
  0x2e   : > { %s1472_s21 = sand.u32 (!%p1400_p3), 1, %s1283_s10  }
  0x2f   : > { %372 = sbr.rel (%p1400_p3) target bundleno = 349 (0x15d), region = 48  ;;  %s853_s1 = sshll.u32 (!%p1400_p3), %s1472_s21, 3 }
  0x30   : > { %s378_s20 = scalar_lea.vmem (!%p1400_p3), [#allocation2], %s853_s1 }
  0x31   : > { %s359_s26 = scalar_lea.hbm %s1661_s0, %s851_s23  ;;  %s375_s23 = scalar_lea.sflag (!%p1400_p3), [#allocation3], %s1472_s21 }
  0x32   : > { %s361_s5 = sshll.u32 %s359_s26, 4  ;;  %s362_s5 = int_to_ptr.hbm [resolvable:$true] %s361_s5 }
  0x33   : > { %949 = dma.hbm_to_vmem [thread:$0]  (!%p947_p8), %s362_s5, 128, %s364_s18, %s351_s28  }
  0x34   : > { %1258 = dma.done.wait (%p1441_p12), %s375_s23, 128  }
  0x35   : > { %1260 = vsyncadd (%p1441_p12), %s375_s23, 4294967168 }
  0x36   : > { %1262 = dma.done.wait (%p66_p1), [#allocation6], 512  }
  0x37   : > { %1264 = vsyncadd (%p66_p1), [#allocation6], 4294966784 }
  0x38   : > { %1266 = dma.done.wait (%p66_p1), [#allocation9], 256  }
  0x39   : > { %1268 = vsyncadd (%p66_p1), [#allocation9], 4294967040  ;;  %v908_v0 = vld [vmem:[#allocation5 + $0x8] sm:$0xff]  ;;  %v910_v1 = vld [vmem:[#allocation7 + $0x8] sm:$0xff]  ;;  %vm462_vm0 = vcmask 261120   ;;  %s1662_s2 = sld [smem:[#allocation22_spill]] }
  0x3a   : > { %v912_v2 = vld [vmem:[#allocation8 + $0x8] sm:$0xff]  ;;  %v907_v3 = vld [vmem:[#allocation5] sm:$0xff]  ;;  %472 = vmatpush.bf16.msra.mxu0 %v908_v0  ;;  %505 = vmatpush.bf16.msra.mxu1 %v910_v1  ;;  %v909_v4 = vld [vmem:[#allocation7] sm:$0xff]  ;;  %s1663_s4 = sld [smem:[#allocation24_spill]]  ;;  %s857_s25 = sshll.u32 %s1472_s21, 4  ;;  %vm546_vm1 = vcmask 60416  }
  0x3b   : > { %v440_v5 = vld [vmem:[%s378_s20] sm:$0xff]  ;;  %538 = vmatpush.bf16.msra.mxu2 %v912_v2  ;;  %v911_v6 = vld [vmem:[#allocation8] sm:$0xff]  ;;  %s1664_s6 = sld [smem:[#allocation26_spill]]  ;;  %s1498_s24 = scalar_lea.vmem [#allocation10], %s857_s25 }
  0x3c   : > { %v441_v7 = vpack.c.bf16 %v440_v5, %v440_v5  ;;  %s1306_s26 = smov 104   ;;  %s1307_s28 = smov 120  }
  0x3d   : > { %s1502_s1 = scalar_lea.vmem [#allocation11], %s857_s25  ;;  %s1308_s23 = smov 112  }
  0x3e   : > { %473 = vmatpush.bf16.msra.mxu0 %v907_v3  ;;  %506 = vmatpush.bf16.msra.mxu1 %v909_v4  ;;  %s1506_s20 = scalar_lea.vmem [#allocation13], %s857_s25  ;;  %s1517_s3 = sshll.u32 %s1291_s12, 4 }
  0x3f   : > { %539 = vmatpush.bf16.msra.mxu2 %v911_v6  ;;  %v1026_v8 = vld [vmem:[%s1662_s2] ss:$0 sm:$0xff]  ;;  %s641_s18 = scalar_lea.hbm %s1640_s8, %s1517_s3  ;;  %s642_s25 = sshll.u32 %s1502_s1, 4  ;;  %s643_s25 = int_to_ptr.vmem [resolvable:$true] %s642_s25 }
  0x40   : > { %v1027_v9 = vld [vmem:[%s1663_s4] ss:$0 sm:$0xff]  ;;  %s605_s22 = sand.u32 1, %s1392_s15   ;;  %s1529_s17 = sshll.u32 %s641_s18, 4  ;;  %s645_s17 = int_to_ptr.hbm [resolvable:$true] %s1529_s17 }
  0x41   : > { %868 = vmatmul.msk.bf16.vlgmr.msra.gmra.mxu0 %vm462_vm0, %v441_v7  ;;  %877 = vmatmul.msk.bf16.vlgmr.msra.gmra.mxu1 %vm462_vm0, %v441_v7  ;;  %v1028_v16 = vld [vmem:[%s1664_s6] ss:$0 sm:$0xff]  ;;  %s623_s19 = scalar_lea.hbm %s1639_s7, %s1517_s3  ;;  %s1544_s15 = scalar_lea.sflag [#allocation12], %s605_s22 }
  0x42   : > { %886 = vmatmul.msk.bf16.vlgmr.msra.gmra.mxu2 %vm462_vm0, %v441_v7  ;;  %s1163_s18 = sshra.s32 %s645_s17, 4  ;;  %s1169_s4 = scalar_lea.hbm %s1640_s8, 32  ;;  %s1164_s18 = int_to_ptr.hbm [resolvable:$true] %s1163_s18 }
  0x43   : > { %s1165_s0 = scalar_lea.hbm %s1164_s18, 16  ;;  %p1170_p10 = scmp.lt.s32.totalorder %s1164_s18, %s1640_s8 }
  0x44   : > { %p1166_p1 = scmp.ne.s32.totalorder %s1164_s18, %s1165_s0  ;;  %p1171_p11 = scmp.lt.s32.totalorder %s1169_s4, %s1165_s0 }
  0x46   : > { %p1167_p3 = pnand %p1166_p1, %p1450_p4  ;;  %p1172_p12 = por %p1171_p11, %p1170_p10 }
  0x48   : > { %p1168_p9 = pneg %p1167_p3 }
  0x4a   : > { %p1173_p13 = pnand %p1172_p12, %p1168_p9 }
  0xbe   : > { %v475_v10 = vpop.f32.mrf.mxu0  ;;  %v508_v11 = vpop.f32.mrf.mxu1 }
  0xbf   : > { %v476_v12 = vadd.f32 %v1026_v8, %v475_v10  ;;  %v509_v13 = vadd.f32 %v1027_v9, %v508_v11 }
  0xc1   : > { %v545_v14 = vpack.c.bf16 %v476_v12, %v476_v12  ;;  %v548_v15 = vpack.c.bf16 %v509_v13, %v509_v13 }
  0xc3   : > { %547 = vst.msk [vmem:[%s1498_s24] sm:$0xf] %vm546_vm1, %v545_v14  ;;  %590 = vrot.lane.b32.xlu1 %v548_v15, %s1306_s26  ;;  %559 = vrot.lane.b32.xlu0 %v548_v15, %s1307_s28 }
  0xc4   : > { %549 = vst.msk [vmem:[%s1502_s1] sm:$0xf] %vm546_vm1, %v548_v15  ;;  %570 = vrot.lane.b32.xlu2 %v545_v14, %s1308_s23 }
  0xc5   : > { %v541_v17 = vpop.f32.mrf.mxu2 }
  0xc6   : > { %v477_v18 = vpop.f32.mrf.mxu0  ;;  %v510_v19 = vpop.f32.mrf.mxu1  ;;  %v542_v20 = vadd.f32 %v1028_v16, %v541_v17 }
  0xc8   : > { %v550_v21 = vpack.c.bf16 %v542_v20, %v542_v20 }
  0xca   : > { %551 = vst.msk [vmem:[%s1506_s20] sm:$0xf] %vm546_vm1, %v550_v21 }
  0xcb   : > { %575 = vrot.lane.b32.xlu0 %v548_v15, %s1308_s23  ;;  %553 = vrot.lane.b32.xlu1 %v545_v14, %s1307_s28 }
  0xcc   : > { %565 = vrot.lane.b32.xlu2 %v550_v21, %s1307_s28  ;;  %s659_s28 = scalar_lea.hbm %s1641_s9, %s1517_s3 }
  0xcd   : > { %v543_v22 = vpop.f32.mrf.mxu2 }
  0xd3   : > { %580 = vrot.lane.b32.xlu0 %v550_v21, %s1308_s23  ;;  %585 = vrot.lane.b32.xlu1 %v545_v14, %s1306_s26 }
  0xd4   : > { %595 = vrot.lane.b32.xlu2 %v550_v21, %s1306_s26 }
 0x11e   : > { %v571_v23 = vpop.permute.xlu2 %570 }
 0x11f   : > { %890 = vst.msk [vmem:[%s1498_s24 + $0x8] sm:$0xf] %vm546_vm1, %v571_v23 }
 0x126   : > { %v566_v24 = vpop.permute.xlu2 %565 }
 0x127   : > { %889 = vst.msk [vmem:[%s1506_s20 + $0x4] sm:$0xf] %vm546_vm1, %v566_v24 }
 0x12e   : > { %v596_v25 = vpop.permute.xlu2 %595 }
 0x12f   : > { %895 = vst.msk [vmem:[%s1506_s20 + $0xc] sm:$0xf] %vm546_vm1, %v596_v25 }
 0x135   : > { %v591_v26 = vpop.permute.xlu1 %590  ;;  %v560_v27 = vpop.permute.xlu0 %559 }
 0x136   : > { %894 = vst.msk [vmem:[%s1502_s1 + $0xc] sm:$0xf] %vm546_vm1, %v591_v26 }
 0x137   : > { %888 = vst.msk [vmem:[%s1502_s1 + $0x4] sm:$0xf] %vm546_vm1, %v560_v27 }
 0x13d   : > { %v576_v28 = vpop.permute.xlu0 %575  ;;  %v554_v29 = vpop.permute.xlu1 %553 }
 0x13e   : > { %891 = vst.msk [vmem:[%s1502_s1 + $0x8] sm:$0xf] %vm546_vm1, %v576_v28 }
 0x13f   : > { %887 = vst.msk [vmem:[%s1498_s24 + $0x4] sm:$0xf] %vm546_vm1, %v554_v29 }
 0x140   : > { %1176 = shalt.err (!%p1173_p13)
}
 0x141   : > { %s1309_s3 = smov 64   ;;  %s1310_s22 = smov 4  }
 0x142   : > { %931 = dma.vmem_to_hbm [thread:$0]  (%p1450_p4), %s643_s25, 256, %s645_s17, %s1544_s15, %s1309_s3, %s1309_s3, %s1310_s22  }
 0x143   : > { %s624_s2 = sshll.u32 %s1498_s24, 4  ;;  %s1561_s6 = sshll.u32 %s623_s19, 4  ;;  %s625_s2 = int_to_ptr.vmem [resolvable:$true] %s624_s2  ;;  %s627_s6 = int_to_ptr.hbm [resolvable:$true] %s1561_s6 }
 0x144   : > { %s660_s0 = sshll.u32 %s1506_s20, 4  ;;  %s1564_s4 = sshll.u32 %s659_s28, 4  ;;  %s1567_s0 = int_to_ptr.vmem [resolvable:$true] %s660_s0  ;;  %s663_s4 = int_to_ptr.hbm [resolvable:$true] %s1564_s4 }
 0x145   : > { %v581_v30 = vpop.permute.xlu0 %580  ;;  %v586_v31 = vpop.permute.xlu1 %585  ;;  %s601_s25 = scalar_lea.sflag [#allocation4], %s1472_s21  ;;  %s1191_s17 = sshra.s32 %s627_s6, 4  ;;  %s1192_s17 = int_to_ptr.hbm [resolvable:$true] %s1191_s17 }
 0x146   : > { %892 = vst.msk [vmem:[%s1506_s20 + $0x8] sm:$0xf] %vm546_vm1, %v581_v30  ;;  %s1193_s26 = scalar_lea.hbm %s1192_s17, 16  ;;  %s1197_s5 = scalar_lea.hbm %s1639_s7, 32 }
 0x147   : > { %893 = vst.msk [vmem:[%s1498_s24 + $0xc] sm:$0xf] %vm546_vm1, %v586_v31  ;;  %p1194_p0 = scmp.ne.s32.totalorder %s1192_s17, %s1193_s26  ;;  %p1198_p8 = scmp.lt.s32.totalorder %s1192_s17, %s1639_s7 }
 0x148   : > { %p1199_p1 = scmp.lt.s32.totalorder %s1197_s5, %s1193_s26 }
 0x149   : > { %p1195_p2 = pnand %p1194_p0, %p1450_p4 }
 0x14a   : > { %p1200_p3 = por %p1199_p1, %p1198_p8 }
 0x14b   : > { %p1196_p5 = pneg %p1195_p2 }
 0x14d   : > { %p1201_p9 = pnand %p1200_p3, %p1196_p5 }
 0x14f   : > { %1204 = shalt.err (!%p1201_p9)
}
 0x150   : > { %930 = dma.vmem_to_hbm [thread:$0]  (%p1450_p4), %s625_s2, 256, %s627_s6, %s601_s25, %s1309_s3, %s1309_s3, %s1310_s22  }
 0x151   : > { %s1219_s21 = sshra.s32 %s663_s4, 4  ;;  %s1225_s12 = scalar_lea.hbm %s1641_s9, 32  ;;  %s1220_s21 = int_to_ptr.hbm [resolvable:$true] %s1219_s21 }
 0x152   : > { %s1221_s24 = scalar_lea.hbm %s1220_s21, 16  ;;  %p1226_p13 = scmp.lt.s32.totalorder %s1220_s21, %s1641_s9 }
 0x153   : > { %p1222_p10 = scmp.ne.s32.totalorder %s1220_s21, %s1221_s24  ;;  %p1227_p0 = scmp.lt.s32.totalorder %s1225_s12, %s1221_s24 }
 0x155   : > { %p1223_p11 = pnand %p1222_p10, %p1450_p4  ;;  %p1228_p2 = por %p1227_p0, %p1226_p13 }
 0x157   : > { %p1224_p12 = pneg %p1223_p11 }
 0x159   : > { %p1229_p5 = pnand %p1228_p2, %p1224_p12 }
 0x15b   : > { %1232 = shalt.err (!%p1229_p5)
}
 0x15c   : > { %932 = dma.vmem_to_hbm [thread:$0]  (%p1450_p4), %s1567_s0, 256, %s663_s4, %s1544_s15, %s1309_s3, %s1309_s3, %s1310_s22  }
 0x15d PF: > { %s677_s2 = sand.u32 1, %s1279_s30   ;;  %p951_p8 = pnand %p849_p6, %p1458_p7 }
 0x15e   : > { %s678_s6 = scalar_lea.sflag [#allocation4], %s677_s2 }
 0x15f   : > { %p952_p1 = pneg %p951_p8 }
 0x161   : > { %1270 = dma.done.wait (%p952_p1), %s678_s6, 256  }
 0x162   : > { %1272 = vsyncadd (%p952_p1), %s678_s6, 4294967040  ;;  %s1665_s27 = sadd.s32 4294967294, %s1299_s14  }
 0x163   : > { %s687_s25 = sand.u32 1, %s1665_s27  }
 0x164   : > { %s688_s28 = scalar_lea.sflag [#allocation12], %s687_s25 }
 0x165   : > { %1274 = dma.done.wait (%p952_p1), %s688_s28, 512  }
 0x166   : > { %1276 = vsyncadd (%p952_p1), %s688_s28, 4294966784  ;;  %s31_s14 = sadd.s32 1, %s1299_s14   ;;  %s1666_s16 = sld [smem:[#allocation19_spill]] }
 0x167   : > { %p28_p4 = scmp.ge.s32.totalorder %s31_s14, 4   ;;  %s1667_s30 = smov %s1283_s10 }
 0x168   : > { %s1668_s10 = smov %s1287_s11  ;;  %s1669_s11 = smov %s1456_s29 }
 0x169   : > { %s1670_s12 = smov %s1295_s13  ;;  %30 = sbr.rel (!%p28_p4) target bundleno = 18 (0x12), region = 146 }
 0x16c   : > { %s1671_s13 = smov %s1666_s16 }
 0x16e   :  { %704 = vsyncpa [#allocation3], 1 }
 0x16f   :  { %706 = vsyncpa [#allocation3 + $0x1], 1 }
 0x170   :  { %707 = vsyncpa [#allocation6], 1 }
 0x171   :  { %708 = vsyncpa [#allocation9], 1 }
 0x172   :  { %709 = vsyncpa [#allocation4], 1 }
 0x173   :  { %711 = vsyncpa [#allocation4 + $0x1], 1 }
 0x174   :  { %712 = vsyncpa [#allocation12], 1 }
 0x175   :  { %714 = vsyncpa [#allocation12 + $0x1], 1 }

</bundles_post_ra>
